<compile_context>
chip_gen: v7x
topology: tpu7x:2x2x1
jax: 0.10.0
libtpu: 0.0.40
codegen_flags: <defaults>
</compile_context>

<pallas_src>
import functools

import jax
import jax.numpy as jnp
from jax.experimental import pallas as pl
from jax.experimental.pallas import tpu as pltpu

NEG_SLOPE = 0.01  # F.leaky_relu default


def _leaky(x):
    # max(x, a*x) == leaky_relu(x) for 0 < a < 1; mul+max instead of cmp+mul+select.
    return jnp.maximum(x, NEG_SLOPE * x)


def resnet_kernel(idx_ref, idxt_ref, scale_ref, vals_ref,
                  w1_ref, b1_ref, w2_ref, b2_ref, out_ref, *, nrows, ncols):
    G = nrows + ncols          # gather columns: [col one-hot | row one-hot]
    R = G + 1                  # reduce rows:    [col | row | global-mean]

    vals = vals_ref[...]                                   # [nnz, Dp] f32
    nnz = vals.shape[0]

    idx = idx_ref[...]                                     # [2, nnz] int32 (lane-major)
    row_l = idx[0:1, :]                                    # [1, nnz]
    col_l = idx[1:2, :]                                    # [1, nnz]
    idxt = idxt_ref[...]                                   # [nnz, 2] int32 (sublane-major)
    row_s = idxt[:, 0:1]                                   # [nnz, 1]
    col_s = idxt[:, 1:2]                                   # [nnz, 1]

    # ---- Fused reduce matrix [R, nnz]: col one-hots (scaled by 1/col_cnt),
    #      row one-hots (scaled by 1/row_cnt), and a final 1/nnz row.  Built
    #      once, reused by both layers, stored bf16 (identical to the
    #      DEFAULT-precision MXU operand truncation, half the VMEM).
    r_iota = jax.lax.broadcasted_iota(jnp.int32, (R, nnz), 0)
    reduce_mask = ((r_iota == col_l)
                   | ((r_iota - ncols) == row_l)
                   | (r_iota == G))
    reduce_mat = jnp.where(reduce_mask, scale_ref[...], 0.0).astype(jnp.bfloat16)

    # ---- Gather matrix [nnz, G] materialized directly in gather orientation
    #      from an iota compare (pure VPU; no implicit XLU transpose in the dot).
    g_iota = jax.lax.broadcasted_iota(jnp.int32, (nnz, G), 1)
    gather_mask = (g_iota == col_s) | ((g_iota - ncols) == row_s)
    gather_oh = gather_mask.astype(jnp.bfloat16)           # [nnz, G]

    def exchangable(v_f32, w_ref, b_ref):
        # w_ref: [4, Dp, Dp] bf16 weight blocks for [vals, pool0, pool1, gmean]
        wv, wc, wr, wg = w_ref[0], w_ref[1], w_ref[2], w_ref[3]
        v_bf = v_f32.astype(jnp.bfloat16)

        # One big-K reduce: col means, row means and the global mean together.
        means = jnp.dot(reduce_mat, v_bf,
                        preferred_element_type=jnp.float32)        # [R, Dp] f32
        col_mean = means[:ncols]                                   # [ncols, Dp]
        row_mean = means[ncols:G]                                  # [nrows, Dp]
        gmean = means[G:R]                                         # [1, Dp]

        # Apply the Linear blocks on the SMALL side, then ONE fused gather:
        # (gather_oh @ [col_mean@Wc ; row_mean@Wr]) == pool0@Wc + pool1@Wr.
        cw = jnp.dot(col_mean.astype(jnp.bfloat16), wc,
                     preferred_element_type=jnp.float32)           # [ncols, Dp]
        rw = jnp.dot(row_mean.astype(jnp.bfloat16), wr,
                     preferred_element_type=jnp.float32)           # [nrows, Dp]
        pooled_w = jnp.concatenate([cw, rw], axis=0).astype(jnp.bfloat16)  # [G, Dp]
        pool_term = jnp.dot(gather_oh, pooled_w,
                            preferred_element_type=jnp.float32)    # [nnz, Dp]

        # Global-mean term folded into the bias (tiny [1,Dp]@[Dp,Dp] matmul).
        eff_b = b_ref[...] + jnp.dot(gmean.astype(jnp.bfloat16), wg,
                                     preferred_element_type=jnp.float32)   # [1, Dp]

        out = (jnp.dot(v_bf, wv, preferred_element_type=jnp.float32)
               + pool_term + eff_b)
        return _leaky(out)

    v1 = exchangable(vals, w1_ref, b1_ref)
    v2 = exchangable(v1, w2_ref, b2_ref)

    out_ref[...] = _leaky(vals + v2)   # residual in exact f32, lane-dense store


def _split_pad_linear(w, b, d, d_pad):
    """Split nn.Linear(4d, d) weight [d, 4d] into four [d, d] blocks (acting on
    [vals, pool0, pool1, gmean]), transposed, zero-padded to [d_pad, d_pad] and
    cast to bf16 (exact same numerics as DEFAULT MXU operand truncation);
    bias padded to [1, d_pad] f32."""
    w = w.astype(jnp.float32)
    blocks = []
    for k in range(4):
        blk = jnp.zeros((d_pad, d_pad), jnp.float32)
        blk = blk.at[:d, :d].set(w[:, k * d:(k + 1) * d].T)
        blocks.append(blk)
    b_pad = jnp.zeros((1, d_pad), jnp.float32).at[0, :d].set(b.astype(jnp.float32))
    return jnp.stack(blocks).astype(jnp.bfloat16), b_pad   # [4, Dp, Dp] bf16, [1, Dp] f32


def _vmem_limit_bytes(nnz, nrows, ncols, d_pad):
    """Generation-aware VMEM budget from the actual resident buffer sizes."""
    G = nrows + ncols
    onehots = ((G + 1) * nnz + nnz * G) * 2                # bf16 reduce + gather matrices
    acts = 4 * nnz * d_pad * 4                             # vals, v1, v2, out (f32)
    weights = 2 * (4 * d_pad * d_pad * 2 + d_pad * 4)      # bf16 weight blocks + f32 bias
    misc = (8 * max(nnz, 128) + nnz * 128 + (G + 9) * 128) * 4  # padded idx/scale buffers
    estimate = onehots + acts + weights + misc
    try:
        physical = pltpu.get_tpu_info().vmem_capacity_bytes
    except Exception:
        physical = 64 * 1024 * 1024                        # conservative: v7x per-TC VMEM
    ceiling = (physical * 4) // 5                          # ~80% of physical
    return int(min(ceiling, max(2 * estimate, 32 * 1024 * 1024)))


def resnet_forward(indices, values, w1, b1, w2, b2, *, nrows, ncols):
    nnz, d = values.shape
    d_pad = max(128, ((d + 127) // 128) * 128)   # lane-dense feature axis

    row = indices[0].astype(jnp.int32)
    col = indices[1].astype(jnp.int32)
    idx = jnp.stack([row, col])                            # [2, nnz] lane-major (reduce)
    idx_t = idx.T                                          # [nnz, 2] sublane-major (gather)

    # Hoisted counts -> reciprocals + the 1/nnz global-mean row, computed once.
    ones = jnp.ones((nnz,), jnp.float32)
    inv_row = (1.0 / jnp.maximum(jax.ops.segment_sum(ones, row, nrows), 1.0))[:, None]
    inv_col = (1.0 / jnp.maximum(jax.ops.segment_sum(ones, col, ncols), 1.0))[:, None]
    scale = jnp.concatenate(
        [inv_col, inv_row, jnp.full((1, 1), 1.0 / nnz, jnp.float32)], axis=0)  # [R, 1]

    vals_p = jnp.pad(values.astype(jnp.float32), ((0, 0), (0, d_pad - d)))
    w1b, b1p = _split_pad_linear(w1, b1, d, d_pad)
    w2b, b2p = _split_pad_linear(w2, b2, d, d_pad)

    kernel = functools.partial(resnet_kernel, nrows=nrows, ncols=ncols)
    vmem = pl.BlockSpec(memory_space=pltpu.MemorySpace.VMEM)
    out_p = pl.pallas_call(
        kernel,
        out_shape=jax.ShapeDtypeStruct((nnz, d_pad), jnp.float32),
        in_specs=[vmem] * 8,
        out_specs=vmem,
        compiler_params=pltpu.CompilerParams(
            vmem_limit_bytes=_vmem_limit_bytes(nnz, nrows, ncols, d_pad)),
    )(idx, idx_t, scale, vals_p, w1b, b1p, w2b, b2p)

    return out_p[:, :d]   # drop the zero lane padding


# ----- pure-JAX reference (mirrors the PyTorch math) -----
def ref_forward(indices, values, w1, b1, w2, b2, *, nrows, ncols):
    row, col = indices[0], indices[1]

    def ex(vals, w, b):
        ones = jnp.ones((vals.shape[0], 1), jnp.float32)
        col_sum = jax.ops.segment_sum(vals, col, ncols)
        col_cnt = jax.ops.segment_sum(ones, col, ncols)
        pool0 = (col_sum / jnp.maximum(col_cnt, 1.0))[col]
        row_sum = jax.ops.segment_sum(vals, row, nrows)
        row_cnt = jax.ops.segment_sum(ones, row, nrows)
        pool1 = (row_sum / jnp.maximum(row_cnt, 1.0))[row]
        gmean = jnp.broadcast_to(vals.mean(0, keepdims=True), vals.shape)
        inp = jnp.concatenate([vals, pool0, pool1, gmean], axis=1)
        return _leaky(inp @ w.T + b)

    v1 = ex(values, w1, b1)
    v2 = ex(v1, w2, b2)
    return _leaky(values + v2)


if __name__ == "__main__":
    NROWS, NCOLS, NNZ, D = 8, 8, 32, 8   # in_dim == out_dim == D (required by residual)

    key = jax.random.PRNGKey(0)
    k_idx, k_val, k_w1, k_b1, k_w2, k_b2 = jax.random.split(key, 6)

    # 32 unique (row, col) pairs out of the 8x8 grid -> coalesced COO indices
    flat = jax.random.choice(k_idx, NROWS * NCOLS, shape=(NNZ,), replace=False)
    indices = jnp.stack([flat // NCOLS, flat % NCOLS]).astype(jnp.int32)  # [2, nnz]
    values = jax.random.normal(k_val, (NNZ, D), dtype=jnp.float32)        # [nnz, D]

    # nn.Linear(4D, D) style init: weight [D, 4D], bias [D]
    bound = 1.0 / jnp.sqrt(4.0 * D)
    w1 = jax.random.uniform(k_w1, (D, 4 * D), minval=-bound, maxval=bound)
    b1 = jax.random.uniform(k_b1, (D,), minval=-bound, maxval=bound)
    w2 = jax.random.uniform(k_w2, (D, 4 * D), minval=-bound, maxval=bound)
    b2 = jax.random.uniform(k_b2, (D,), minval=-bound, maxval=bound)

    out = resnet_forward(indices, values, w1, b1, w2, b2,
                         nrows=NROWS, ncols=NCOLS)
    out = jax.block_until_ready(out)

    ref = ref_forward(indices, values, w1, b1, w2, b2,
                      nrows=NROWS, ncols=NCOLS)
    assert out.shape == (NNZ, D)
    # Tolerance accounts for bf16 matmul operands (== DEFAULT single-pass MXU
    # precision, with the count reciprocals now folded into the bf16 reduce
    # matrix) vs. the exact-f32 segment_sum reference.
    assert jnp.allclose(out, ref, rtol=2.5e-2, atol=2.5e-2)

    print("KERNEL_OK")
</pallas_src>

<mosaic_0001>
module attributes {stable_mosaic.version = 11 : i64} {
  func.func @resnet_kernel(%arg0: memref<2x32xi32, #tpu.memory_space<vmem>>, %arg1: memref<32x2xi32, #tpu.memory_space<vmem>>, %arg2: memref<17x1xf32, #tpu.memory_space<vmem>>, %arg3: memref<32x128xf32, #tpu.memory_space<vmem>>, %arg4: memref<4x128x128xbf16, #tpu.memory_space<vmem>>, %arg5: memref<1x128xf32, #tpu.memory_space<vmem>>, %arg6: memref<4x128x128xbf16, #tpu.memory_space<vmem>>, %arg7: memref<1x128xf32, #tpu.memory_space<vmem>>, %arg8: memref<32x128xf32, #tpu.memory_space<vmem>>) attributes {dimension_semantics = [], scalar_prefetch = 0 : i64, scratch_operands = 0 : i64, tpu.core_type = #tpu.core_type<tc>} {
    %c0 = arith.constant 0 : index
    %c0_0 = arith.constant 0 : index
    %0 = vector.load %arg3[%c0, %c0_0] : memref<32x128xf32, #tpu.memory_space<vmem>>, vector<32x128xf32>
    %c0_1 = arith.constant 0 : index
    %c0_2 = arith.constant 0 : index
    %1 = vector.load %arg0[%c0_1, %c0_2] : memref<2x32xi32, #tpu.memory_space<vmem>>, vector<2x32xi32>
    %2 = vector.extract_strided_slice %1 {offsets = [0, 0], sizes = [1, 32], strides = [1, 1]} : vector<2x32xi32> to vector<1x32xi32>
    %3 = vector.extract_strided_slice %1 {offsets = [1, 0], sizes = [1, 32], strides = [1, 1]} : vector<2x32xi32> to vector<1x32xi32>
    %c0_3 = arith.constant 0 : index
    %c0_4 = arith.constant 0 : index
    %4 = vector.load %arg1[%c0_3, %c0_4] : memref<32x2xi32, #tpu.memory_space<vmem>>, vector<32x2xi32>
    %5 = vector.extract_strided_slice %4 {offsets = [0, 0], sizes = [32, 1], strides = [1, 1]} : vector<32x2xi32> to vector<32x1xi32>
    %6 = vector.extract_strided_slice %4 {offsets = [0, 1], sizes = [32, 1], strides = [1, 1]} : vector<32x2xi32> to vector<32x1xi32>
    %7 = tpu.iota {dimensions = array<i32: 0>} : vector<17x32xi32>
    %8 = vector.broadcast %3 : vector<1x32xi32> to vector<17x32xi32>
    %9 = arith.cmpi eq, %7, %8 : vector<17x32xi32>
    %c8_i32 = arith.constant 8 : i32
    %10 = vector.broadcast %c8_i32 : i32 to vector<17x32xi32>
    %11 = arith.subi %7, %10 : vector<17x32xi32>
    %12 = vector.broadcast %2 : vector<1x32xi32> to vector<17x32xi32>
    %13 = arith.cmpi eq, %11, %12 : vector<17x32xi32>
    %14 = arith.ori %9, %13 : vector<17x32xi1>
    %c16_i32 = arith.constant 16 : i32
    %15 = vector.broadcast %c16_i32 : i32 to vector<17x32xi32>
    %16 = arith.cmpi eq, %7, %15 : vector<17x32xi32>
    %17 = arith.ori %14, %16 : vector<17x32xi1>
    %c0_5 = arith.constant 0 : index
    %c0_6 = arith.constant 0 : index
    %18 = vector.load %arg2[%c0_5, %c0_6] : memref<17x1xf32, #tpu.memory_space<vmem>>, vector<17x1xf32>
    %cst = arith.constant 0.000000e+00 : f32
    %19 = vector.shape_cast %18 : vector<17x1xf32> to vector<17x1xf32>
    %20 = vector.broadcast %19 : vector<17x1xf32> to vector<17x32xf32>
    %21 = vector.broadcast %cst : f32 to vector<17x32xf32>
    %22 = arith.select %17, %20, %21 : vector<17x32xi1>, vector<17x32xf32>
    %23 = arith.truncf %22 : vector<17x32xf32> to vector<17x32xbf16>
    %24 = tpu.iota {dimensions = array<i32: 1>} : vector<32x16xi32>
    %25 = vector.broadcast %6 : vector<32x1xi32> to vector<32x16xi32>
    %26 = arith.cmpi eq, %24, %25 : vector<32x16xi32>
    %c8_i32_7 = arith.constant 8 : i32
    %27 = vector.broadcast %c8_i32_7 : i32 to vector<32x16xi32>
    %28 = arith.subi %24, %27 : vector<32x16xi32>
    %29 = vector.broadcast %5 : vector<32x1xi32> to vector<32x16xi32>
    %30 = arith.cmpi eq, %28, %29 : vector<32x16xi32>
    %31 = arith.ori %26, %30 : vector<32x16xi1>
    %32 = arith.extui %31 : vector<32x16xi1> to vector<32x16xi32>
    %33 = arith.sitofp %32 : vector<32x16xi32> to vector<32x16xf32>
    %34 = arith.truncf %33 : vector<32x16xf32> to vector<32x16xbf16>
    %c0_8 = arith.constant 0 : index
    %c0_9 = arith.constant 0 : index
    %c0_10 = arith.constant 0 : index
    %35 = vector.load %arg4[%c0_8, %c0_9, %c0_10] : memref<4x128x128xbf16, #tpu.memory_space<vmem>>, vector<1x128x128xbf16>
    %36 = vector.shape_cast %35 : vector<1x128x128xbf16> to vector<128x128xbf16>
    %c1 = arith.constant 1 : index
    %c0_11 = arith.constant 0 : index
    %c0_12 = arith.constant 0 : index
    %37 = vector.load %arg4[%c1, %c0_11, %c0_12] : memref<4x128x128xbf16, #tpu.memory_space<vmem>>, vector<1x128x128xbf16>
    %38 = vector.shape_cast %37 : vector<1x128x128xbf16> to vector<128x128xbf16>
    %c2 = arith.constant 2 : index
    %c0_13 = arith.constant 0 : index
    %c0_14 = arith.constant 0 : index
    %39 = vector.load %arg4[%c2, %c0_13, %c0_14] : memref<4x128x128xbf16, #tpu.memory_space<vmem>>, vector<1x128x128xbf16>
    %40 = vector.shape_cast %39 : vector<1x128x128xbf16> to vector<128x128xbf16>
    %c3 = arith.constant 3 : index
    %c0_15 = arith.constant 0 : index
    %c0_16 = arith.constant 0 : index
    %41 = vector.load %arg4[%c3, %c0_15, %c0_16] : memref<4x128x128xbf16, #tpu.memory_space<vmem>>, vector<1x128x128xbf16>
    %42 = vector.shape_cast %41 : vector<1x128x128xbf16> to vector<128x128xbf16>
    %43 = arith.truncf %0 : vector<32x128xf32> to vector<32x128xbf16>
    %cst_17 = arith.constant dense<0.000000e+00> : vector<17x128xf32>
    %44 = tpu.matmul %23, %43, %cst_17 {dimension_numbers = #tpu.dot_dimension_numbers<[1], [0], [0], [1], [0, 0, 1, 1], [], []>} : vector<17x32xbf16>, vector<32x128xbf16>, vector<17x128xf32> -> vector<17x128xf32>
    %45 = vector.extract_strided_slice %44 {offsets = [0, 0], sizes = [8, 128], strides = [1, 1]} : vector<17x128xf32> to vector<8x128xf32>
    %46 = vector.extract_strided_slice %44 {offsets = [8, 0], sizes = [8, 128], strides = [1, 1]} : vector<17x128xf32> to vector<8x128xf32>
    %47 = vector.extract_strided_slice %44 {offsets = [16, 0], sizes = [1, 128], strides = [1, 1]} : vector<17x128xf32> to vector<1x128xf32>
    %48 = arith.truncf %45 : vector<8x128xf32> to vector<8x128xbf16>
    %cst_18 = arith.constant dense<0.000000e+00> : vector<8x128xf32>
    %49 = tpu.matmul %48, %38, %cst_18 {dimension_numbers = #tpu.dot_dimension_numbers<[1], [0], [0], [1], [0, 0, 1, 1], [], []>} : vector<8x128xbf16>, vector<128x128xbf16>, vector<8x128xf32> -> vector<8x128xf32>
    %50 = arith.truncf %46 : vector<8x128xf32> to vector<8x128xbf16>
    %cst_19 = arith.constant dense<0.000000e+00> : vector<8x128xf32>
    %51 = tpu.matmul %50, %40, %cst_19 {dimension_numbers = #tpu.dot_dimension_numbers<[1], [0], [0], [1], [0, 0, 1, 1], [], []>} : vector<8x128xbf16>, vector<128x128xbf16>, vector<8x128xf32> -> vector<8x128xf32>
    %52 = tpu.concatenate %49, %51 in 0 : vector<8x128xf32>, vector<8x128xf32> -> vector<16x128xf32>
    %53 = arith.truncf %52 : vector<16x128xf32> to vector<16x128xbf16>
    %cst_20 = arith.constant dense<0.000000e+00> : vector<32x128xf32>
    %54 = tpu.matmul %34, %53, %cst_20 {dimension_numbers = #tpu.dot_dimension_numbers<[1], [0], [0], [1], [0, 0, 1, 1], [], []>} : vector<32x16xbf16>, vector<16x128xbf16>, vector<32x128xf32> -> vector<32x128xf32>
    %c0_21 = arith.constant 0 : index
    %c0_22 = arith.constant 0 : index
    %55 = vector.load %arg5[%c0_21, %c0_22] : memref<1x128xf32, #tpu.memory_space<vmem>>, vector<1x128xf32>
    %56 = arith.truncf %47 : vector<1x128xf32> to vector<1x128xbf16>
    %cst_23 = arith.constant dense<0.000000e+00> : vector<1x128xf32>
    %57 = tpu.matmul %56, %42, %cst_23 {dimension_numbers = #tpu.dot_dimension_numbers<[1], [0], [0], [1], [0, 0, 1, 1], [], []>} : vector<1x128xbf16>, vector<128x128xbf16>, vector<1x128xf32> -> vector<1x128xf32>
    %58 = arith.addf %55, %57 : vector<1x128xf32>
    %cst_24 = arith.constant dense<0.000000e+00> : vector<32x128xf32>
    %59 = tpu.matmul %43, %36, %cst_24 {dimension_numbers = #tpu.dot_dimension_numbers<[1], [0], [0], [1], [0, 0, 1, 1], [], []>} : vector<32x128xbf16>, vector<128x128xbf16>, vector<32x128xf32> -> vector<32x128xf32>
    %60 = arith.addf %59, %54 : vector<32x128xf32>
    %61 = vector.broadcast %58 : vector<1x128xf32> to vector<32x128xf32>
    %62 = arith.addf %60, %61 : vector<32x128xf32>
    %cst_25 = arith.constant 0.00999999977 : f32
    %63 = vector.broadcast %cst_25 : f32 to vector<32x128xf32>
    %64 = arith.mulf %63, %62 : vector<32x128xf32>
    %65 = arith.maximumf %62, %64 : vector<32x128xf32>
    %c0_26 = arith.constant 0 : index
    %c0_27 = arith.constant 0 : index
    %c0_28 = arith.constant 0 : index
    %66 = vector.load %arg6[%c0_26, %c0_27, %c0_28] : memref<4x128x128xbf16, #tpu.memory_space<vmem>>, vector<1x128x128xbf16>
    %67 = vector.shape_cast %66 : vector<1x128x128xbf16> to vector<128x128xbf16>
    %c1_29 = arith.constant 1 : index
    %c0_30 = arith.constant 0 : index
    %c0_31 = arith.constant 0 : index
    %68 = vector.load %arg6[%c1_29, %c0_30, %c0_31] : memref<4x128x128xbf16, #tpu.memory_space<vmem>>, vector<1x128x128xbf16>
    %69 = vector.shape_cast %68 : vector<1x128x128xbf16> to vector<128x128xbf16>
    %c2_32 = arith.constant 2 : index
    %c0_33 = arith.constant 0 : index
    %c0_34 = arith.constant 0 : index
    %70 = vector.load %arg6[%c2_32, %c0_33, %c0_34] : memref<4x128x128xbf16, #tpu.memory_space<vmem>>, vector<1x128x128xbf16>
    %71 = vector.shape_cast %70 : vector<1x128x128xbf16> to vector<128x128xbf16>
    %c3_35 = arith.constant 3 : index
    %c0_36 = arith.constant 0 : index
    %c0_37 = arith.constant 0 : index
    %72 = vector.load %arg6[%c3_35, %c0_36, %c0_37] : memref<4x128x128xbf16, #tpu.memory_space<vmem>>, vector<1x128x128xbf16>
    %73 = vector.shape_cast %72 : vector<1x128x128xbf16> to vector<128x128xbf16>
    %74 = arith.truncf %65 : vector<32x128xf32> to vector<32x128xbf16>
    %cst_38 = arith.constant dense<0.000000e+00> : vector<17x128xf32>
    %75 = tpu.matmul %23, %74, %cst_38 {dimension_numbers = #tpu.dot_dimension_numbers<[1], [0], [0], [1], [0, 0, 1, 1], [], []>} : vector<17x32xbf16>, vector<32x128xbf16>, vector<17x128xf32> -> vector<17x128xf32>
    %76 = vector.extract_strided_slice %75 {offsets = [0, 0], sizes = [8, 128], strides = [1, 1]} : vector<17x128xf32> to vector<8x128xf32>
    %77 = vector.extract_strided_slice %75 {offsets = [8, 0], sizes = [8, 128], strides = [1, 1]} : vector<17x128xf32> to vector<8x128xf32>
    %78 = vector.extract_strided_slice %75 {offsets = [16, 0], sizes = [1, 128], strides = [1, 1]} : vector<17x128xf32> to vector<1x128xf32>
    %79 = arith.truncf %76 : vector<8x128xf32> to vector<8x128xbf16>
    %cst_39 = arith.constant dense<0.000000e+00> : vector<8x128xf32>
    %80 = tpu.matmul %79, %69, %cst_39 {dimension_numbers = #tpu.dot_dimension_numbers<[1], [0], [0], [1], [0, 0, 1, 1], [], []>} : vector<8x128xbf16>, vector<128x128xbf16>, vector<8x128xf32> -> vector<8x128xf32>
    %81 = arith.truncf %77 : vector<8x128xf32> to vector<8x128xbf16>
    %cst_40 = arith.constant dense<0.000000e+00> : vector<8x128xf32>
    %82 = tpu.matmul %81, %71, %cst_40 {dimension_numbers = #tpu.dot_dimension_numbers<[1], [0], [0], [1], [0, 0, 1, 1], [], []>} : vector<8x128xbf16>, vector<128x128xbf16>, vector<8x128xf32> -> vector<8x128xf32>
    %83 = tpu.concatenate %80, %82 in 0 : vector<8x128xf32>, vector<8x128xf32> -> vector<16x128xf32>
    %84 = arith.truncf %83 : vector<16x128xf32> to vector<16x128xbf16>
    %cst_41 = arith.constant dense<0.000000e+00> : vector<32x128xf32>
    %85 = tpu.matmul %34, %84, %cst_41 {dimension_numbers = #tpu.dot_dimension_numbers<[1], [0], [0], [1], [0, 0, 1, 1], [], []>} : vector<32x16xbf16>, vector<16x128xbf16>, vector<32x128xf32> -> vector<32x128xf32>
    %c0_42 = arith.constant 0 : index
    %c0_43 = arith.constant 0 : index
    %86 = vector.load %arg7[%c0_42, %c0_43] : memref<1x128xf32, #tpu.memory_space<vmem>>, vector<1x128xf32>
    %87 = arith.truncf %78 : vector<1x128xf32> to vector<1x128xbf16>
    %cst_44 = arith.constant dense<0.000000e+00> : vector<1x128xf32>
    %88 = tpu.matmul %87, %73, %cst_44 {dimension_numbers = #tpu.dot_dimension_numbers<[1], [0], [0], [1], [0, 0, 1, 1], [], []>} : vector<1x128xbf16>, vector<128x128xbf16>, vector<1x128xf32> -> vector<1x128xf32>
    %89 = arith.addf %86, %88 : vector<1x128xf32>
    %cst_45 = arith.constant dense<0.000000e+00> : vector<32x128xf32>
    %90 = tpu.matmul %74, %67, %cst_45 {dimension_numbers = #tpu.dot_dimension_numbers<[1], [0], [0], [1], [0, 0, 1, 1], [], []>} : vector<32x128xbf16>, vector<128x128xbf16>, vector<32x128xf32> -> vector<32x128xf32>
    %91 = arith.addf %90, %85 : vector<32x128xf32>
    %92 = vector.broadcast %89 : vector<1x128xf32> to vector<32x128xf32>
    %93 = arith.addf %91, %92 : vector<32x128xf32>
    %cst_46 = arith.constant 0.00999999977 : f32
    %94 = vector.broadcast %cst_46 : f32 to vector<32x128xf32>
    %95 = arith.mulf %94, %93 : vector<32x128xf32>
    %96 = arith.maximumf %93, %95 : vector<32x128xf32>
    %97 = arith.addf %0, %96 : vector<32x128xf32>
    %cst_47 = arith.constant 0.00999999977 : f32
    %98 = vector.broadcast %cst_47 : f32 to vector<32x128xf32>
    %99 = arith.mulf %98, %97 : vector<32x128xf32>
    %100 = arith.maximumf %97, %99 : vector<32x128xf32>
    %c0_48 = arith.constant 0 : index
    %c0_49 = arith.constant 0 : index
    %101 = vector.load %arg8[%c0_48, %c0_49] : memref<32x128xf32, #tpu.memory_space<vmem>>, vector<32x128xf32>
    tpu.vector_store %arg8[%c0_48, %c0_49], %100 {strides = array<i32>} : memref<32x128xf32, #tpu.memory_space<vmem>>, vector<32x128xf32>,
    return
  }
}

</mosaic_0001>

<bundles_post_ra>
// kernel: tpu_custom_call.1
= control target key start
LH: loop header
LB: loop body
LE: loop exit
PB: predicated region body
PF: predicated region fallthrough
CT: control target
= control target key end

     0   :  { %13 = vsyncpa [#allocation3], 0  ;;  %s2110_s0 = inlined_call_operand.vmem [shape: s32[2,32], index: 0, kind: input, shape index: {}]   ;;  %s2111_s1 = inlined_call_operand.vmem [shape: s32[32,2], index: 1, kind: input, shape index: {}]   ;;  %s2112_s2 = inlined_call_operand.vmem [shape: f32[17,1], index: 2, kind: input, shape index: {}]   ;;  %s2113_s3 = inlined_call_operand.vmem [shape: f32[32,128], index: 3, kind: input, shape index: {}]   ;;  %s2114_s4 = inlined_call_operand.hbm [shape: bf16[4,128,128], index: 4, kind: input, shape index: {}]   ;;  %s2115_s5 = inlined_call_operand.vmem [shape: f32[1,128], index: 5, kind: input, shape index: {}]   ;;  %s2116_s6 = inlined_call_operand.hbm [shape: bf16[4,128,128], index: 6, kind: input, shape index: {}]   ;;  %s2117_s7 = inlined_call_operand.vmem [shape: f32[1,128], index: 7, kind: input, shape index: {}]   ;;  %s2118_s8 = inlined_call_operand.hbm [shape: f32[32,128], index: 8, kind: output, shape index: {}]  }
   0x1   :  { %14 = vsyncpa [#allocation6], 0 }
   0x2   :  { %15 = vsyncpa [#allocation4], 0  ;;  %s1845_s27 = smov [#allocation2]   ;;  %s1773_s9 = scalar_lea.hbm %s2114_s4, 4096 }
   0x3   :  { %s29_s28 = sshll.u32 %s1845_s27, 4  ;;  %p1774_p0 = scmp.ne.s32.totalorder %s2114_s4, %s1773_s9  ;;  %s30_s28 = int_to_ptr.vmem [resolvable:$true] %s29_s28 }
   0x4   :  { %p1777_p1 = scmp.lt.u32.totalorder %s1773_s9, %s2114_s4 }
   0x6   :  { %p1779_p2 = pnand %p1777_p1, %p1774_p0 }
   0x8   :  { %1782 = shalt.err (!%p1779_p2)
}
   0x9   :  { %s1783_s14 = scalar_lea.vmem %s30_s28, 4096  ;;  %p1788_p4 = scmp.lt.s32.totalorder %s30_s28, %s30_s28 }
   0xa   :  { %p1784_p3 = scmp.ne.s32.totalorder %s30_s28, %s1783_s14  ;;  %p1789_p5 = scmp.lt.s32.totalorder %s1783_s14, %s1783_s14 }
   0xc   :  { %p1790_p6 = por %p1789_p5, %p1788_p4 }
   0xe   :  { %p1791_p7 = pnand %p1790_p6, %p1784_p3 }
  0x10   :  { %1794 = shalt.err (!%p1791_p7)
}
  0x11   :  { %s1846_s15 = smov 64   ;;  %s1847_s16 = smov 4  }
  0x12   :  { %35 = dma.hbm_to_vmem [thread:$0]  %s2114_s4, 4096, %s30_s28, [#allocation3], %s1846_s15, %s1846_s15, %s1847_s16  }
  0x13   :  { %s1848_s19 = smov [#allocation5]   ;;  %s1795_s23 = scalar_lea.hbm %s2116_s6, 4096 }
  0x14   :  { %s43_s20 = sshll.u32 %s1848_s19, 4  ;;  %p1796_p8 = scmp.ne.s32.totalorder %s2116_s6, %s1795_s23  ;;  %s44_s20 = int_to_ptr.vmem [resolvable:$true] %s43_s20 }
  0x15   :  { %p1799_p9 = scmp.lt.u32.totalorder %s1795_s23, %s2116_s6 }
  0x17   :  { %p1801_p10 = pnand %p1799_p9, %p1796_p8 }
  0x19   :  { %1804 = shalt.err (!%p1801_p10)
}
  0x1a   :  { %s1805_s29 = scalar_lea.vmem %s44_s20, 4096  ;;  %p1810_p12 = scmp.lt.s32.totalorder %s44_s20, %s44_s20 }
  0x1b   :  { %p1806_p11 = scmp.ne.s32.totalorder %s44_s20, %s1805_s29  ;;  %p1811_p13 = scmp.lt.s32.totalorder %s1805_s29, %s1805_s29 }
  0x1d   :  { %p1812_p0 = por %p1811_p13, %p1810_p12 }
  0x1f   :  { %p1813_p1 = pnand %p1812_p0, %p1806_p11 }
  0x21   :  { %1816 = shalt.err (!%p1813_p1)
}
  0x22   :  { %49 = dma.hbm_to_vmem [thread:$0]  %s2116_s6, 4096, %s44_s20, [#allocation6], %s1846_s15, %s1846_s15, %s1847_s16  }
  0x23   :  { %1839 = dma.done.wait [#allocation3], 4096  }
  0x24   :  { %1840 = vsyncadd [#allocation3], 4294963200 }
  0x25   :  { %1841 = dma.done.wait [#allocation6], 4096  }
  0x26   :  { %1842 = vsyncadd [#allocation6], 4294963200  ;;  %v1849_v0 = vmov 0   ;;  %v97_v1 = vld [vmem:[%s2112_s2] sm:$0xff]  ;;  %v98_v2 = vld [vmem:[%s2112_s2 + $0x8] sm:$0xff]  ;;  %v1850_v12 = vmov 0.0   ;;  %v68_v19 = vlaneseq }
  0x27   :  { %1693 = vset.pattern.permute.xlu0 %v1849_v0  ;;  %v1694_v3 = vpack.i.bf16 %v98_v2, %v97_v1  ;;  %v59_v4 = vld [vmem:[%s2113_s3] sm:$0xff]  ;;  %v60_v5 = vld [vmem:[%s2113_s3 + $0x8] sm:$0xff]  ;;  %v99_v6 = vld [vmem:[%s2112_s2 + $0x10] sm:$0x1]  ;;  %1494 = vmatprep.subr.bf16.mxu1 %v1850_v12  ;;  %vm238_vm11 = vcmask 261120   ;;  %vm1851_vm12 = vmmov 0  }
  0x28   :  { %v1941_v7 = vpack.c.bf16 %v60_v5, %v59_v4  ;;  %v61_v8 = vld [vmem:[%s2113_s3 + $0x10] sm:$0xff]  ;;  %v62_v9 = vld [vmem:[%s2113_s3 + $0x18] sm:$0xff]  ;;  %v1705_v11 = vld [vmem:[#allocation2 + $0x40] sm:$0xff]   ;;  %v69_v20 = vshrl.u32 %v68_v19, 7  ;;  %1510 = vmatprep.mubr.msk.bf16.mxu1 %vm1851_vm12, %v1850_v12  ;;  %v1852_v50 = vmov 1   ;;  %v121_v4 = vand.u32 127, %v68_v19 }
  0x29   :  { %1695 = vperm.xlu0 %1693, %v1694_v3   ;;  %v1950_v10 = vpack.c.bf16 %v62_v9, %v61_v8  ;;  %1495 = vmatpush3.bf16.msra.mxu1 %v1705_v11  ;;  %v1707_v13 = vld [vmem:[#allocation2 + $0x48] sm:$0xff]   ;;  %v1709_v14 = vld [vmem:[#allocation2 + $0x50] sm:$0xff]   ;;  %v1711_v15 = vld [vmem:[#allocation2 + $0x58] sm:$0xff]   ;;  %s1853_s14 = smov [#allocation7]  }
  0x2a   :  { %1486 = vmatprep.subr.bf16.mxu0 %v1941_v7  ;;  %1496 = vmatprep.subr.bf16.mxu1 %v1850_v12  ;;  %v1713_v16 = vld [vmem:[#allocation2 + $0x60] sm:$0xff]   ;;  %v1715_v17 = vld [vmem:[#allocation2 + $0x68] sm:$0xff]   ;;  %v1717_v18 = vld [vmem:[#allocation2 + $0x70] sm:$0xff]   ;;  %v71_v21 = vadd.s32 16, %v69_v20  ;;  %v74_v22 = vsub.s32 1, %v69_v20  ;;  %v1965_v23 = vsub.s32 0, %v69_v20 }
  0x2b   :  { %1487 = vmatpush3.bf16.msra.mxu0 %v1941_v7  ;;  %v63_v24 = vld [vmem:[%s2110_s0] sm:$0x3]  ;;  %v1319_v28 = vadd.s32 4294967288, %v69_v20  ;;  %v70_v29 = vadd.s32 8, %v69_v20  ;;  %v1708_v40 = vld [vmem:[#allocation2 + $0x88] sm:$0xff]   ;;  %v1710_v41 = vld [vmem:[#allocation2 + $0x90] sm:$0xff]   ;;  %1699 = vset.pattern.permute.xlu1 %v1852_v50 }
  0x2c   :  { %1488 = vmatprep.subr.bf16.mxu0 %v1950_v10  ;;  %v1320_v25 = vadd.s32 4294967288, %v71_v21  ;;  %v75_v26 = vrot.slane %v63_v24, %v74_v22  ;;  %v84_v27 = vrot.slane %v63_v24, %v1965_v23  ;;  %vm93_vm7 = vcmp.eq.s32.totalorder %v71_v21, 16  ;;  %v1706_v38 = vld [vmem:[#allocation2 + $0x80] sm:$0xff]   ;;  %v1712_v42 = vld [vmem:[#allocation2 + $0x98] sm:$0xff]   ;;  %v1716_v44 = vld [vmem:[#allocation2 + $0xa8] sm:$0xff]   ;;  %s1306_s15 = sshll.u32 %s1853_s14, 4  ;;  %s1307_s15 = int_to_ptr.vmem [resolvable:$true] %s1306_s15 }
  0x2d   :  { %112 = vperm.xlu0 %1693, %v99_v6   ;;  %1497 = vmatpush3.bf16.msra.mxu1 %v1707_v13  ;;  %v1714_v43 = vld [vmem:[#allocation2 + $0xa0] sm:$0xff]   ;;  %v1718_v45 = vld [vmem:[#allocation2 + $0xb0] sm:$0xff]   ;;  %v1719_v46 = vld [vmem:[#allocation2 + $0x78] sm:$0xff]   ;;  %v1321_v8 = vadd.s32 4294967288, %v121_v4  ;;  %s1817_s16 = scalar_lea.vmem %s1307_s15, 512  ;;  %p1822_p3 = scmp.lt.s32.totalorder %s1307_s15, %s1307_s15 }
  0x2e   :  { %1498 = vmatprep.subr.bf16.mxu1 %v1850_v12  ;;  %vm78_vm0 = vcmp.eq.s32.totalorder %v71_v21, %v75_v26  ;;  %vm87_vm1 = vcmp.eq.s32.totalorder %v1320_v25, %v84_v27  ;;  %vm76_vm2 = vcmp.eq.s32.totalorder %v69_v20, %v75_v26  ;;  %vm85_vm3 = vcmp.eq.s32.totalorder %v1319_v28, %v84_v27  ;;  %v1720_v47 = vld [vmem:[#allocation2 + $0xb8] sm:$0xff]   ;;  %v64_v48 = vld [vmem:[%s2111_s1] sm:$0xff]  ;;  %v66_v49 = vld [vmem:[%s2111_s1 + $0x10] sm:$0xff]  ;;  %p1818_p2 = scmp.ne.s32.totalorder %s1307_s15, %s1817_s16  ;;  %p1823_p4 = scmp.lt.s32.totalorder %s1817_s16, %s1817_s16 }
  0x2f   :  { %1489 = vmatpush3.bf16.msra.mxu0 %v1950_v10  ;;  %vm77_vm4 = vcmp.eq.s32.totalorder %v70_v29, %v75_v26  ;;  %vm86_vm5 = vcmp.eq.s32.totalorder %v69_v20, %v84_v27  ;;  %vm90_vm6 = vmor %vm78_vm0, %vm87_vm1  ;;  %123 = vperm.xlu1 %1699, %v64_v48   ;;  %v65_v51 = vld [vmem:[%s2111_s1 + $0x8] sm:$0xff]  ;;  %v67_v52 = vld [vmem:[%s2111_s1 + $0x18] sm:$0xff] }
  0x30   :  { %1514 = vmatprep.subr.bf16.mxu0 %v1850_v12  ;;  %vm88_vm8 = vmor %vm76_vm2, %vm85_vm3  ;;  %v1721_v58 = vld [vmem:[#allocation2 + $0xc0] sm:$0xff]   ;;  %v1722_v60 = vld [vmem:[#allocation2 + $0xc8] sm:$0xff]   ;;  %vm472_vm3 = vcmask 130048   ;;  %p1824_p5 = por %p1823_p4, %p1822_p3 }
  0x31   :  { %1499 = vmatpush3.bf16.msra.mxu1 %v1709_v14  ;;  %vm89_vm9 = vmor %vm77_vm4, %vm86_vm5  ;;  %1701 = vset.pattern.permute.xlu0 %v1852_v50  ;;  %v1723_v61 = vld [vmem:[#allocation2 + $0xd0] sm:$0xff]   ;;  %v1724_v62 = vld [vmem:[#allocation2 + $0xd8] sm:$0xff]  }
  0x32   :  { %1500 = vmatprep.subr.bf16.mxu1 %v1850_v12  ;;  %vm96_vm10 = vmor %vm90_vm6, %vm93_vm7  ;;  %129 = vperm.xlu0 %1701, %v66_v49   ;;  %v1725_v63 = vld [vmem:[#allocation2 + $0xe0] sm:$0xff]   ;;  %v1727_v1 = vld [vmem:[#allocation2 + $0xf0] sm:$0xff]   ;;  %p1825_p6 = pnand %p1824_p5, %p1818_p2 }
  0x33   :  { %126 = vperm.xlu1 %1699, %v65_v51   ;;  %v1728_v2 = vld [vmem:[#allocation2 + $0xf8] sm:$0xff]  }
  0x35   :  { %1501 = vmatpush3.bf16.msra.mxu1 %v1711_v15 }
  0x36   :  { %1502 = vmatprep.subr.bf16.mxu1 %v1850_v12  ;;  %1702 = vset.pattern.permute.xlu0 %v1849_v0 }
  0x37   :  { %140 = vperm.xlu0 %1702, %v64_v48   ;;  %1700 = vset.pattern.permute.xlu1 %v1849_v0  ;;  %v1743_v48 = vld [vmem:[#allocation5 + $0x58] sm:$0xff]  }
  0x38   :  { %143 = vperm.xlu1 %1700, %v65_v51   ;;  %v528_v51 = vld [vmem:[%s2115_s5] sm:$0x1] }
  0x39   :  { %1503 = vmatpush3.bf16.msra.mxu1 %v1713_v16 }
  0x3a   :  { %1504 = vmatprep.subr.bf16.mxu1 %v1850_v12 }
  0x3b   :  { %149 = vperm.xlu0 %1702, %v67_v52  }
  0x3c   :  { %1703 = vset.pattern.permute.xlu1 %v1852_v50  ;;  %v1749_v50 = vld [vmem:[#allocation5 + $0x70] sm:$0xff]  }
  0x3d   :  { %1505 = vmatpush3.bf16.msra.mxu1 %v1715_v17  ;;  %132 = vperm.xlu1 %1703, %v67_v52  }
  0x3e   :  { %1506 = vmatprep.subr.bf16.mxu1 %v1850_v12 }
  0x41   :  { %1507 = vmatpush3.bf16.msra.mxu1 %v1717_v18  ;;  %1704 = vset.pattern.permute.xlu1 %v1849_v0  ;;  %v1726_v0 = vld [vmem:[#allocation2 + $0xe8] sm:$0xff]  }
  0x42   :  { %1508 = vmatprep.subr.bf16.mxu1 %v1850_v12  ;;  %146 = vperm.xlu1 %1704, %v66_v49   ;;  %v1745_v49 = vld [vmem:[#allocation5 + $0x60] sm:$0xff]  }
  0x45   :  { %1509 = vmatpush3.bf16.msra.mxu1 %v1719_v46  ;;  %v1739_v46 = vld [vmem:[#allocation5 + $0x48] sm:$0xff]  }
  0xa8   :  { %v1696_v30 = vpop.permute.xlu0 %1695 }
  0xa9   :  { %v1698_v31 = vunpack.i.h.bf16 %v1696_v30  ;;  %v1697_v32 = vunpack.i.l.bf16 %v1696_v30 }
  0xab   :  { %v115_v33 = vsel %vm88_vm8, %v1697_v32, 0.0  ;;  %v116_v34 = vsel %vm89_vm9, %v1698_v31, 0.0  ;;  %v1729_v31 = vld [vmem:[#allocation2] sm:$0xff]  }
  0xac   :  { %v113_v35 = vpop.permute.xlu0 %112  ;;  %v1971_v36 = vpack.c.bf16 %v116_v34, %v115_v33  ;;  %v1730_v34 = vld [vmem:[#allocation2 + $0x8] sm:$0xff]  }
  0xad   :  { %v117_v37 = vsel %vm96_vm10, %v113_v35, 0.0  ;;  %v1731_v35 = vld [vmem:[#allocation2 + $0x10] sm:$0xff]  }
  0xae   :  { %v1973_v39 = vpack.c.bf16 %v117_v37, %v117_v37  ;;  %1490 = vmatprep.mubr.msk.bf16.mxu0 %vm238_vm11, %v1971_v36  ;;  %v124_v5 = vpop.permute.xlu1 %123  ;;  %v1733_v37 = vld [vmem:[#allocation2 + $0x20] sm:$0xff]  }
  0xaf   :  { %vm134_vm13 = vcmp.eq.s32.totalorder %v121_v4, %v124_v5 }
  0xb0   :  { %1491 = vmatmul.mubr.msk.bf16.vlgmr.msra.gmra.mrb[0].mxu0 %vm238_vm11, %v1973_v39 }
  0xb1   :  { %1515 = vmatpush3.bf16.msra.mxu0 %v1706_v38  ;;  %1530 = vmatprep.mubr.msk.bf16.mxu0 %vm1851_vm12, %v1850_v12  ;;  %v130_v6 = vpop.permute.xlu0 %129  ;;  %v1734_v38 = vld [vmem:[#allocation2 + $0x28] sm:$0xff]  }
  0xb2   :  { %1516 = vmatprep.subr.bf16.mxu0 %v1850_v12  ;;  %v127_v9 = vpop.permute.xlu1 %126  ;;  %vm136_vm7 = vcmp.eq.s32.totalorder %v121_v4, %v130_v6 }
  0xb3   :  { %vm135_vm0 = vcmp.eq.s32.totalorder %v121_v4, %v127_v9  ;;  %v1738_v9 = vld [vmem:[#allocation5 + $0x80] sm:$0xff]  }
  0xb5   :  { %1517 = vmatpush3.bf16.msra.mxu0 %v1708_v40  ;;  %v1735_v40 = vld [vmem:[#allocation2 + $0x30] sm:$0xff]  }
  0xb6   :  { %1518 = vmatprep.subr.bf16.mxu0 %v1850_v12  ;;  %v141_v11 = vpop.permute.xlu0 %140 }
  0xb7   :  { %vm151_vm14 = vcmp.eq.s32.totalorder %v1321_v8, %v141_v11  ;;  %v144_v13 = vpop.permute.xlu1 %143  ;;  %v1740_v11 = vld [vmem:[#allocation5 + $0x88] sm:$0xff]  }
  0xb8   :  { %vm155_vm15 = vmor %vm134_vm13, %vm151_vm14  ;;  %vm152_vm1 = vcmp.eq.s32.totalorder %v1321_v8, %v144_v13  ;;  %v1742_v13 = vld [vmem:[#allocation5 + $0x90] sm:$0xff]  }
  0xb9   :  { %1519 = vmatpush3.bf16.msra.mxu0 %v1710_v41  ;;  %v1322_v14 = vsel %vm155_vm15, 1.0, %v1850_v12  ;;  %vm156_vm2 = vmor %vm135_vm0, %vm152_vm1  ;;  %v1736_v41 = vld [vmem:[#allocation2 + $0x38] sm:$0xff]  }
  0xba   :  { %1520 = vmatprep.subr.bf16.mxu0 %v1850_v12  ;;  %v150_v15 = vpop.permute.xlu0 %149  ;;  %v1323_v16 = vsel %vm156_vm2, 1.0, %v1850_v12 }
  0xbb   :  { %v2020_v17 = vpack.c.bf16 %v1323_v16, %v1322_v14  ;;  %vm154_vm4 = vcmp.eq.s32.totalorder %v1321_v8, %v150_v15  ;;  %v1744_v14 = vld [vmem:[#allocation5 + $0x98] sm:$0xff]   ;;  %v1746_v15 = vld [vmem:[#allocation5 + $0xa0] sm:$0xff]   ;;  %v1750_v16 = vld [vmem:[#allocation5 + $0xb0] sm:$0xff]  }
  0xbc   :  { %v133_v18 = vpop.permute.xlu1 %132 }
  0xbd   :  { %1521 = vmatpush3.bf16.msra.mxu0 %v1712_v42  ;;  %vm137_vm5 = vcmp.eq.s32.totalorder %v121_v4, %v133_v18  ;;  %v1751_v18 = vld [vmem:[#allocation5 + $0x78] sm:$0xff]  }
  0xbe   :  { %1522 = vmatprep.subr.bf16.mxu0 %v1850_v12  ;;  %vm158_vm6 = vmor %vm137_vm5, %vm154_vm4 }
  0xbf   :  { %v1325_v20 = vsel %vm158_vm6, 1.0, %v1850_v12 }
  0xc1   :  { %1523 = vmatpush3.bf16.msra.mxu0 %v1714_v43  ;;  %v147_v19 = vpop.permute.xlu1 %146 }
  0xc2   :  { %1524 = vmatprep.subr.bf16.mxu0 %v1850_v12  ;;  %vm153_vm8 = vcmp.eq.s32.totalorder %v1321_v8, %v147_v19  ;;  %v1752_v19 = vld [vmem:[#allocation5 + $0xb8] sm:$0xff]  }
  0xc3   :  { %vm157_vm9 = vmor %vm136_vm7, %vm153_vm8 }
  0xc4   :  { %v1324_v21 = vsel %vm157_vm9, 1.0, %v1850_v12 }
  0xc5   :  { %1525 = vmatpush3.bf16.msra.mxu0 %v1716_v44  ;;  %v2026_v22 = vpack.c.bf16 %v1325_v20, %v1324_v21 }
  0xc6   :  { %1526 = vmatprep.subr.bf16.mxu0 %v1850_v12 }
  0xc9   :  { %1527 = vmatpush3.bf16.msra.mxu0 %v1718_v45  ;;  %v1737_v45 = vld [vmem:[#allocation5 + $0x40] sm:$0xff]  }
  0xca   :  { %1528 = vmatprep.subr.bf16.mxu0 %v1850_v12 }
  0xcd   :  { %1529 = vmatpush3.bf16.msra.mxu0 %v1720_v47  ;;  %v1741_v47 = vld [vmem:[#allocation5 + $0x50] sm:$0xff]  }
  0xce   :  { %1540 = vmatprep.subr.bf16.mxu0 %v1850_v12 }
 0x183   :  { %v1492_v53 = vpop.f32.mrb[0].mxu0 }
 0x184   :  { %v279_v54 = vpop.f32.mrb[1].mxu0  ;;  %v529_v3 = vpack.c.bf16 %v1492_v53, %v1492_v53 }
 0x185   :  { %v293_v55 = vpack.c.bf16 %v279_v54, %v279_v54  ;;  %v1493_v56 = vpop.f32.mrb[2].mxu0 }
 0x186   :  { %v282_v57 = vpop.f32.mrb[3].mxu0 }
 0x187   :  { %v382_v59 = vpack.c.bf16 %v282_v57, %v282_v57  ;;  %1511 = vmatmul.mubr.bf16.vlgmr.msra.gmra.mrb[0].mxu1 %v293_v55 }
 0x188   :  { %1536 = vmatprep.mubr.msk.bf16.mxu1 %vm472_vm3, %v2020_v17 }
 0x189   :  { %1531 = vmatmul.mubr.bf16.vlgmr.msra.gmra.mrb[4].mxu0 %v382_v59 }
 0x18a   :  { %1541 = vmatpush3.bf16.msra.mxu0 %v1721_v58  ;;  %1556 = vmatprep.mubr.msk.bf16.mxu0 %vm1851_vm12, %v1850_v12 }
 0x18b   :  { %1542 = vmatprep.subr.bf16.mxu0 %v1850_v12 }
 0x18e   :  { %1543 = vmatpush3.bf16.msra.mxu0 %v1722_v60 }
 0x18f   :  { %1544 = vmatprep.subr.bf16.mxu0 %v1850_v12 }
 0x192   :  { %1545 = vmatpush3.bf16.msra.mxu0 %v1723_v61 }
 0x193   :  { %1546 = vmatprep.subr.bf16.mxu0 %v1850_v12 }
 0x196   :  { %1547 = vmatpush3.bf16.msra.mxu0 %v1724_v62 }
 0x197   :  { %1548 = vmatprep.subr.bf16.mxu0 %v1850_v12 }
 0x19a   :  { %1549 = vmatpush3.bf16.msra.mxu0 %v1725_v63 }
 0x19b   :  { %1550 = vmatprep.subr.bf16.mxu0 %v1850_v12 }
 0x19e   :  { %1551 = vmatpush3.bf16.msra.mxu0 %v1726_v0 }
 0x19f   :  { %1552 = vmatprep.subr.bf16.mxu0 %v1850_v12 }
 0x1a2   :  { %1553 = vmatpush3.bf16.msra.mxu0 %v1727_v1 }
 0x1a3   :  { %1554 = vmatprep.subr.bf16.mxu0 %v1850_v12 }
 0x1a6   :  { %1555 = vmatpush3.bf16.msra.mxu0 %v1728_v2 }
 0x1a9   :  { %1557 = vmatmul.mubr.bf16.vlgmr.msra.gmra.mrb[8].mxu0 %v529_v3 }
 0x1aa   :  { %1584 = vmatprep.mubr.msk.bf16.mxu0 %vm238_vm11, %v1971_v36  ;;  %v1732_v36 = vld [vmem:[#allocation2 + $0x18] sm:$0xff]  }
 0x25a   :  { %v376_v24 = vpop.f32.mrb[0].mxu1 }
 0x25b   :  { %v1512_v25 = vpop.f32.mrb[1].mxu1 }
 0x25c   :  { %v379_v26 = vpop.f32.mrb[2].mxu1  ;;  %v465_v27 = vpop.f32.mrb[4].mxu0 }
 0x25d   :  { %v471_v28 = vpack.c.bf16 %v465_v27, %v376_v24  ;;  %v1513_v29 = vpop.f32.mrb[3].mxu1  ;;  %v1532_v30 = vpop.f32.mrb[5].mxu0  ;;  %v1753_v27 = vld [vmem:[#allocation5 + $0xc0] sm:$0xff]  }
 0x25e   :  { %v468_v32 = vpop.f32.mrb[6].mxu0  ;;  %v1754_v29 = vld [vmem:[#allocation5 + $0xc8] sm:$0xff]   ;;  %v1755_v30 = vld [vmem:[#allocation5 + $0xd0] sm:$0xff]  }
 0x25f   :  { %v1533_v33 = vpop.f32.mrb[7].mxu0  ;;  %1534 = vmatprep.subr.bf16.mxu1 %v471_v28  ;;  %v1757_v32 = vld [vmem:[#allocation5 + $0xe0] sm:$0xff]  }
 0x260   :  { %1535 = vmatpush3.bf16.msra.mxu1 %v471_v28  ;;  %v1759_v33 = vld [vmem:[#allocation5 + $0xf0] sm:$0xff]  }
 0x261   :  { %1560 = vmatprep.subr.bf16.mxu1 %v1729_v31 }
 0x263   :  { %1537 = vmatmul.mubr.msk.bf16.vlgmr.msra.gmra.mrb[4].mxu1 %vm472_vm3, %v2026_v22 }
 0x264   :  { %1561 = vmatpush3.bf16.msra.mxu1 %v1729_v31  ;;  %1576 = vmatprep.mubr.bf16.mxu1 %v1941_v7  ;;  %v1756_v31 = vld [vmem:[#allocation5 + $0xd8] sm:$0xff]  }
 0x265   :  { %1562 = vmatprep.subr.bf16.mxu1 %v1730_v34 }
 0x268   :  { %1563 = vmatpush3.bf16.msra.mxu1 %v1730_v34  ;;  %v1760_v34 = vld [vmem:[#allocation5 + $0xf8] sm:$0xff]  }
 0x269   :  { %1564 = vmatprep.subr.bf16.mxu1 %v1731_v35 }
 0x26c   :  { %1565 = vmatpush3.bf16.msra.mxu1 %v1731_v35 }
 0x26d   :  { %1566 = vmatprep.subr.bf16.mxu1 %v1732_v36 }
 0x270   :  { %1567 = vmatpush3.bf16.msra.mxu1 %v1732_v36 }
 0x271   :  { %1568 = vmatprep.subr.bf16.mxu1 %v1733_v37 }
 0x274   :  { %1569 = vmatpush3.bf16.msra.mxu1 %v1733_v37 }
 0x275   :  { %1570 = vmatprep.subr.bf16.mxu1 %v1734_v38 }
 0x278   :  { %1571 = vmatpush3.bf16.msra.mxu1 %v1734_v38 }
 0x279   :  { %1572 = vmatprep.subr.bf16.mxu1 %v1735_v40 }
 0x27c   :  { %v612_v42 = vpop.f32.mrb[8].mxu0  ;;  %1573 = vmatpush3.bf16.msra.mxu1 %v1735_v40 }
 0x27d   :  { %v1558_v7 = vpop.f32.mrb[9].mxu0  ;;  %1574 = vmatprep.subr.bf16.mxu1 %v1736_v41  ;;  %v618_v52 = vadd.f32 %v612_v42, %v528_v51 }
 0x27e   :  { %v615_v43 = vpop.f32.mrb[10].mxu0 }
 0x27f   :  { %v1559_v44 = vpop.f32.mrb[11].mxu0  ;;  %v720_v53 = vrot.slane %v618_v52, %v1965_v23  ;;  %v1761_v43 = vld [vmem:[#allocation5] sm:$0xff]  }
 0x280   :  { %1575 = vmatpush3.bf16.msra.mxu1 %v1736_v41 }
 0x281   :  { %1588 = vmatprep.subr.bf16.mxu1 %v1850_v12 }
 0x283   :  { %1577 = vmatmul.mubr.bf16.vlgmr.msra.gmra.mrb[4].mxu1 %v1950_v10  ;;  %v1747_v10 = vld [vmem:[#allocation5 + $0x68] sm:$0xff]  }
 0x284   :  { %1604 = vmatprep.mubr.msk.bf16.mxu1 %vm1851_vm12, %v1850_v12  ;;  %1589 = vmatpush3.bf16.msra.mxu1 %v1737_v45 }
 0x285   :  { %1590 = vmatprep.subr.bf16.mxu1 %v1850_v12 }
 0x288   :  { %1591 = vmatpush3.bf16.msra.mxu1 %v1739_v46  ;;  %v1762_v46 = vld [vmem:[#allocation5 + $0x8] sm:$0xff]  }
 0x289   :  { %1592 = vmatprep.subr.bf16.mxu1 %v1850_v12 }
 0x28c   :  { %1593 = vmatpush3.bf16.msra.mxu1 %v1741_v47  ;;  %v1764_v47 = vld [vmem:[#allocation5 + $0x18] sm:$0xff]  }
 0x28d   :  { %1594 = vmatprep.subr.bf16.mxu1 %v1850_v12 }
 0x290   :  { %1595 = vmatpush3.bf16.msra.mxu1 %v1743_v48  ;;  %v1765_v48 = vld [vmem:[#allocation5 + $0x20] sm:$0xff]  }
 0x291   :  { %1596 = vmatprep.subr.bf16.mxu1 %v1850_v12 }
 0x294   :  { %1597 = vmatpush3.bf16.msra.mxu1 %v1745_v49  ;;  %v1766_v49 = vld [vmem:[#allocation5 + $0x28] sm:$0xff]  }
 0x295   :  { %1598 = vmatprep.subr.bf16.mxu1 %v1850_v12 }
 0x298   :  { %1599 = vmatpush3.bf16.msra.mxu1 %v1747_v10  ;;  %v1767_v10 = vld [vmem:[#allocation5 + $0x30] sm:$0xff]  }
 0x299   :  { %1600 = vmatprep.subr.bf16.mxu1 %v1850_v12 }
 0x29c   :  { %1601 = vmatpush3.bf16.msra.mxu1 %v1749_v50 }
 0x29d   :  { %1602 = vmatprep.subr.bf16.mxu1 %v1850_v12 }
 0x2a0   :  { %1603 = vmatpush3.bf16.msra.mxu1 %v1751_v18 }
 0x356   :  { %v1578_v54 = vpop.f32.mrb[4].mxu1 }
 0x357   :  { %v724_v55 = vadd.f32 %v1578_v54, %v720_v53  ;;  %v701_v56 = vpop.f32.mrb[5].mxu1  ;;  %v1079_v54 = vld [vmem:[%s2117_s7] sm:$0x1] }
 0x358   :  { %v722_v57 = vadd.f32 %v720_v53, %v701_v56  ;;  %v1579_v58 = vpop.f32.mrb[6].mxu1 }
 0x359   :  { %v728_v59 = vmul.f32 0.01, %v724_v55  ;;  %v725_v60 = vadd.f32 %v1579_v58, %v720_v53  ;;  %v704_v61 = vpop.f32.mrb[7].mxu1 }
 0x35a   :  { %v726_v62 = vmul.f32 0.01, %v722_v57  ;;  %v723_v63 = vadd.f32 %v720_v53, %v704_v61 }
 0x35b   :  { %v729_v0 = vmul.f32 0.01, %v725_v60  ;;  %v732_v2 = vmax.f32 %v724_v55, %v728_v59 }
 0x35c   :  { %v727_v1 = vmul.f32 0.01, %v723_v63  ;;  %v730_v4 = vmax.f32 %v722_v57, %v726_v62 }
 0x35d   :  { %v733_v3 = vmax.f32 %v725_v60, %v729_v0 }
 0x35e   :  { %v731_v5 = vmax.f32 %v723_v63, %v727_v1 }
 0x35f   :  { %v2046_v6 = vpack.c.bf16 %v733_v3, %v732_v2 }
 0x360   :  { %v2048_v8 = vpack.c.bf16 %v731_v5, %v730_v4 }
 0x362   :  { %1580 = vmatprep.subr.bf16.mxu0 %v2048_v8 }
 0x363   :  { %1581 = vmatpush3.bf16.msra.mxu0 %v2048_v8 }
 0x364   :  { %1582 = vmatprep.subr.bf16.mxu0 %v2046_v6 }
 0x367   :  { %1583 = vmatpush3.bf16.msra.mxu0 %v2046_v6 }
 0x368   :  { %1608 = vmatprep.subr.bf16.mxu0 %v1850_v12 }
 0x36a   :  { %1585 = vmatmul.mubr.msk.bf16.vlgmr.msra.gmra.mrb[12].mxu0 %vm238_vm11, %v1973_v39  ;;  %v1748_v39 = vld [vmem:[#allocation5 + $0xa8] sm:$0xff]  }
 0x36b   :  { %1609 = vmatpush3.bf16.msra.mxu0 %v1738_v9  ;;  %1624 = vmatprep.mubr.msk.bf16.mxu0 %vm1851_vm12, %v1850_v12 }
 0x36c   :  { %1610 = vmatprep.subr.bf16.mxu0 %v1850_v12 }
 0x36f   :  { %1611 = vmatpush3.bf16.msra.mxu0 %v1740_v11  ;;  %v1770_v11 = vld [vmem:[%s2113_s3] sm:$0xff] }
 0x370   :  { %1612 = vmatprep.subr.bf16.mxu0 %v1850_v12 }
 0x373   :  { %1613 = vmatpush3.bf16.msra.mxu0 %v1742_v13 }
 0x374   :  { %1614 = vmatprep.subr.bf16.mxu0 %v1850_v12 }
 0x377   :  { %1615 = vmatpush3.bf16.msra.mxu0 %v1744_v14 }
 0x378   :  { %1616 = vmatprep.subr.bf16.mxu0 %v1850_v12 }
 0x37b   :  { %1617 = vmatpush3.bf16.msra.mxu0 %v1746_v15 }
 0x37c   :  { %1618 = vmatprep.subr.bf16.mxu0 %v1850_v12 }
 0x37f   :  { %1619 = vmatpush3.bf16.msra.mxu0 %v1748_v39  ;;  %v1771_v39 = vld [vmem:[%s2113_s3 + $0x18] sm:$0xff] }
 0x380   :  { %1620 = vmatprep.subr.bf16.mxu0 %v1850_v12 }
 0x383   :  { %1621 = vmatpush3.bf16.msra.mxu0 %v1750_v16 }
 0x384   :  { %1622 = vmatprep.subr.bf16.mxu0 %v1850_v12 }
 0x387   :  { %1623 = vmatpush3.bf16.msra.mxu0 %v1752_v19  ;;  %v1772_v19 = vld [vmem:[%s2113_s3 + $0x8] sm:$0xff] }
 0x388   :  { %1634 = vmatprep.subr.bf16.mxu0 %v1850_v12 }
 0x43d   :  { %v1586_v20 = vpop.f32.mrb[12].mxu0 }
 0x43e   :  { %v837_v21 = vpop.f32.mrb[13].mxu0  ;;  %v1080_v35 = vpack.c.bf16 %v1586_v20, %v1586_v20 }
 0x43f   :  { %v851_v24 = vpack.c.bf16 %v837_v21, %v837_v21  ;;  %v1587_v25 = vpop.f32.mrb[14].mxu0 }
 0x440   :  { %v840_v26 = vpop.f32.mrb[15].mxu0 }
 0x441   :  { %v940_v28 = vpack.c.bf16 %v840_v26, %v840_v26  ;;  %1605 = vmatmul.mubr.bf16.vlgmr.msra.gmra.mrb[8].mxu1 %v851_v24 }
 0x442   :  { %1630 = vmatprep.mubr.msk.bf16.mxu1 %vm472_vm3, %v2020_v17  ;;  %v1758_v17 = vld [vmem:[#allocation5 + $0xe8] sm:$0xff]  }
 0x443   :  { %1625 = vmatmul.mubr.bf16.vlgmr.msra.gmra.mrb[16].mxu0 %v940_v28 }
 0x444   :  { %1635 = vmatpush3.bf16.msra.mxu0 %v1753_v27  ;;  %1650 = vmatprep.mubr.msk.bf16.mxu0 %vm1851_vm12, %v1850_v12 }
 0x445   :  { %1636 = vmatprep.subr.bf16.mxu0 %v1850_v12 }
 0x448   :  { %1637 = vmatpush3.bf16.msra.mxu0 %v1754_v29 }
 0x449   :  { %1638 = vmatprep.subr.bf16.mxu0 %v1850_v12 }
 0x44c   :  { %1639 = vmatpush3.bf16.msra.mxu0 %v1755_v30 }
 0x44d   :  { %1640 = vmatprep.subr.bf16.mxu0 %v1850_v12 }
 0x450   :  { %1641 = vmatpush3.bf16.msra.mxu0 %v1756_v31 }
 0x451   :  { %1642 = vmatprep.subr.bf16.mxu0 %v1850_v12 }
 0x454   :  { %1643 = vmatpush3.bf16.msra.mxu0 %v1757_v32 }
 0x455   :  { %1644 = vmatprep.subr.bf16.mxu0 %v1850_v12 }
 0x458   :  { %1645 = vmatpush3.bf16.msra.mxu0 %v1758_v17 }
 0x459   :  { %1646 = vmatprep.subr.bf16.mxu0 %v1850_v12 }
 0x45c   :  { %1647 = vmatpush3.bf16.msra.mxu0 %v1759_v33 }
 0x45d   :  { %1648 = vmatprep.subr.bf16.mxu0 %v1850_v12  ;;  %v1763_v12 = vld [vmem:[#allocation5 + $0x10] sm:$0xff]  }
 0x460   :  { %1649 = vmatpush3.bf16.msra.mxu0 %v1760_v34 }
 0x463   :  { %1651 = vmatmul.mubr.bf16.vlgmr.msra.gmra.mrb[20].mxu0 %v1080_v35 }
 0x514   :  { %v934_v36 = vpop.f32.mrb[8].mxu1 }
 0x515   :  { %v1606_v37 = vpop.f32.mrb[9].mxu1 }
 0x516   :  { %v937_v38 = vpop.f32.mrb[10].mxu1  ;;  %v1023_v40 = vpop.f32.mrb[16].mxu0 }
 0x517   :  { %v1029_v41 = vpack.c.bf16 %v1023_v40, %v934_v36  ;;  %v1607_v42 = vpop.f32.mrb[11].mxu1  ;;  %v1626_v7 = vpop.f32.mrb[17].mxu0 }
 0x518   :  { %v1026_v44 = vpop.f32.mrb[18].mxu0 }
 0x519   :  { %v1627_v45 = vpop.f32.mrb[19].mxu0  ;;  %1628 = vmatprep.subr.bf16.mxu1 %v1029_v41 }
 0x51a   :  { %1629 = vmatpush3.bf16.msra.mxu1 %v1029_v41 }
 0x51b   :  { %1654 = vmatprep.subr.bf16.mxu1 %v1761_v43 }
 0x51d   :  { %1631 = vmatmul.mubr.msk.bf16.vlgmr.msra.gmra.mrb[12].mxu1 %vm472_vm3, %v2026_v22  ;;  %v1768_v22 = vld [vmem:[#allocation5 + $0x38] sm:$0xff]  }
 0x51e   :  { %1655 = vmatpush3.bf16.msra.mxu1 %v1761_v43  ;;  %1670 = vmatprep.mubr.bf16.mxu1 %v2048_v8  ;;  %v1769_v8 = vld [vmem:[%s2113_s3 + $0x10] sm:$0xff] }
 0x51f   :  { %1656 = vmatprep.subr.bf16.mxu1 %v1762_v46 }
 0x522   :  { %1657 = vmatpush3.bf16.msra.mxu1 %v1762_v46 }
 0x523   :  { %1658 = vmatprep.subr.bf16.mxu1 %v1763_v12 }
 0x526   :  { %1659 = vmatpush3.bf16.msra.mxu1 %v1763_v12 }
 0x527   :  { %1660 = vmatprep.subr.bf16.mxu1 %v1764_v47 }
 0x52a   :  { %1661 = vmatpush3.bf16.msra.mxu1 %v1764_v47 }
 0x52b   :  { %1662 = vmatprep.subr.bf16.mxu1 %v1765_v48 }
 0x52e   :  { %1663 = vmatpush3.bf16.msra.mxu1 %v1765_v48 }
 0x52f   :  { %1664 = vmatprep.subr.bf16.mxu1 %v1766_v49 }
 0x532   :  { %1665 = vmatpush3.bf16.msra.mxu1 %v1766_v49 }
 0x533   :  { %1666 = vmatprep.subr.bf16.mxu1 %v1767_v10 }
 0x536   :  { %v1163_v50 = vpop.f32.mrb[20].mxu0  ;;  %1667 = vmatpush3.bf16.msra.mxu1 %v1767_v10 }
 0x537   :  { %v1652_v51 = vpop.f32.mrb[21].mxu0  ;;  %1668 = vmatprep.subr.bf16.mxu1 %v1768_v22  ;;  %v1169_v55 = vadd.f32 %v1163_v50, %v1079_v54 }
 0x538   :  { %v1166_v52 = vpop.f32.mrb[22].mxu0 }
 0x539   :  { %v1653_v53 = vpop.f32.mrb[23].mxu0  ;;  %v1271_v56 = vrot.slane %v1169_v55, %v1965_v23 }
 0x53a   :  { %1669 = vmatpush3.bf16.msra.mxu1 %v1768_v22 }
 0x53d   :  { %1671 = vmatmul.mubr.bf16.vlgmr.msra.gmra.mrb[12].mxu1 %v2046_v6 }
 0x610   :  { %v1672_v57 = vpop.f32.mrb[12].mxu1 }
 0x611   :  { %v1275_v58 = vadd.f32 %v1672_v57, %v1271_v56  ;;  %v1252_v59 = vpop.f32.mrb[13].mxu1 }
 0x612   :  { %v1273_v60 = vadd.f32 %v1271_v56, %v1252_v59  ;;  %v1673_v61 = vpop.f32.mrb[14].mxu1 }
 0x613   :  { %v1279_v62 = vmul.f32 0.01, %v1275_v58  ;;  %v1276_v63 = vadd.f32 %v1673_v61, %v1271_v56  ;;  %v1255_v0 = vpop.f32.mrb[15].mxu1 }
 0x614   :  { %v1277_v1 = vmul.f32 0.01, %v1273_v60  ;;  %v1274_v2 = vadd.f32 %v1271_v56, %v1255_v0 }
 0x615   :  { %v1283_v3 = vmax.f32 %v1275_v58, %v1279_v62  ;;  %v1280_v4 = vmul.f32 0.01, %v1276_v63 }
 0x616   :  { %v1281_v5 = vmax.f32 %v1273_v60, %v1277_v1  ;;  %v1278_v6 = vmul.f32 0.01, %v1274_v2 }
 0x617   :  { %v1287_v9 = vadd.f32 %v1769_v8, %v1283_v3  ;;  %v1284_v23 = vmax.f32 %v1276_v63, %v1280_v4 }
 0x618   :  { %v1285_v13 = vadd.f32 %v1770_v11, %v1281_v5  ;;  %v1282_v14 = vmax.f32 %v1274_v2, %v1278_v6 }
 0x619   :  { %v1291_v15 = vmul.f32 0.01, %v1287_v9  ;;  %v1288_v16 = vadd.f32 %v1771_v39, %v1284_v23 }
 0x61a   :  { %v1289_v18 = vmul.f32 0.01, %v1285_v13  ;;  %v1286_v20 = vadd.f32 %v1772_v19, %v1282_v14 }
 0x61b   :  { %v1295_v21 = vmax.f32 %v1287_v9, %v1291_v15  ;;  %v1292_v24 = vmul.f32 0.01, %v1288_v16 }
 0x61c   :  { %v1293_v25 = vmax.f32 %v1285_v13, %v1289_v18  ;;  %v1290_v26 = vmul.f32 0.01, %v1286_v20 }
 0x61d   :  { %1299 = vst [vmem:[#allocation7 + $0x10] sm:$0xff] %v1295_v21  ;;  %v1296_v27 = vmax.f32 %v1288_v16, %v1292_v24 }
 0x61e   :  { %1297 = vst [vmem:[#allocation7] sm:$0xff] %v1293_v25  ;;  %v1294_v28 = vmax.f32 %v1286_v20, %v1290_v26 }
 0x61f   :  { %1300 = vst [vmem:[#allocation7 + $0x18] sm:$0xff] %v1296_v27 }
 0x620   :  { %1298 = vst [vmem:[#allocation7 + $0x8] sm:$0xff] %v1294_v28 }
 0x621   :  { %1828 = shalt.err (!%p1825_p6)
}
 0x622   :  { %s1829_s18 = scalar_lea.hbm %s2118_s8, 512 }
 0x623   :  { %p1830_p7 = scmp.ne.s32.totalorder %s2118_s8, %s1829_s18  ;;  %p1833_p8 = scmp.lt.u32.totalorder %s1829_s18, %s2118_s8 }
 0x625   :  { %p1835_p9 = pnand %p1833_p8, %p1830_p7 }
 0x627   :  { %1838 = shalt.err (!%p1835_p9)
}
 0x628   :  { %s1854_s0 = smov 128   ;;  %s1855_s22 = smov 8  }
 0x629   :  { %1312 = dma.vmem_to_hbm [thread:$0]  %s1307_s15, 512, %s2118_s8, [#allocation4], %s1854_s0, %s1854_s0, %s1855_s22  }
 0x62a   :  { %1843 = dma.done.wait [#allocation4], 512  }
 0x62b   :  { %1844 = vsyncadd [#allocation4], 4294966784 }
 0x62c   :  { %1316 = vsyncpa [#allocation3], 1 }
 0x62d   :  { %1317 = vsyncpa [#allocation6], 1 }
 0x62e   :  { %1318 = vsyncpa [#allocation4], 1 }

</bundles_post_ra>
